<compile_context>
chip_gen: v7x
topology: tpu7x:2x2x1
jax: 0.10.0
libtpu: 0.0.40
codegen_flags: <defaults>
</compile_context>

<pallas_src>
import jax
import jax.numpy as jnp
from jax.experimental import pallas as pl
from jax.experimental.pallas import tpu as pltpu

_LANES = 128      # vreg lane width (fast axis)
_SUBLANES = 8     # vreg sublane width (slow axis)


def _phi_dot_kernel(wb_ref, x_ref, o_ref):
    # wb_ref: SMEM (2,) scalars [w, b] (scalar prefetch).
    # x_ref / o_ref: VMEM (tile_rows, 128) tiles.
    w = wb_ref[0]
    b = wb_ref[1]
    o_ref[...] = x_ref[...] * w + b


def _round_up(a, m):
    return ((a + m - 1) // m) * m


def phi_dot_0(x, weight, bias, *, max_tile_rows=1024, min_pallas_elems=8192):
    """Forward pass of Phi_Dot_0 (nn.Linear(1, 1)).

    x:      [..., 1] float32
    weight: [1, 1]   float32
    bias:   [1]      float32
    returns same shape as x, equal to x @ weight.T + bias
    """
    orig_shape = x.shape
    dtype = x.dtype
    w = weight.reshape(()).astype(dtype)
    b = bias.reshape(()).astype(dtype)

    n = x.size
    if n < min_pallas_elems:
        # Tiny batch: a plain fused elementwise op beats any kernel dispatch.
        return x * w + b

    # Lane-dense layout: flatten, pad to a whole number of (tile_rows, 128)
    # tiles, compute on the 2-D slab, then slice the padding back off.
    rows_needed = pl.cdiv(n, _LANES)
    tile_rows = min(max_tile_rows, _round_up(rows_needed, _SUBLANES))
    rows = _round_up(rows_needed, tile_rows)
    n_pad = rows * _LANES

    x_flat = x.reshape(-1)
    if n_pad != n:
        x_flat = jnp.pad(x_flat, (0, n_pad - n))
    x2d = x_flat.reshape(rows, _LANES)

    wb = jnp.stack([w, b])  # (2,) scalars -> SMEM via scalar prefetch

    grid_spec = pltpu.PrefetchScalarGridSpec(
        num_scalar_prefetch=1,
        grid=(rows // tile_rows,),
        in_specs=[pl.BlockSpec((tile_rows, _LANES), lambda i, wb_ref: (i, 0))],
        out_specs=pl.BlockSpec((tile_rows, _LANES), lambda i, wb_ref: (i, 0)),
    )

    y2d = pl.pallas_call(
        _phi_dot_kernel,
        out_shape=jax.ShapeDtypeStruct((rows, _LANES), dtype),
        grid_spec=grid_spec,
        compiler_params=pltpu.CompilerParams(
            dimension_semantics=("parallel",),   # 2 TCs on v7x split the grid
            vmem_limit_bytes=32 * 1024 * 1024,   # explicit; safe on v5e/v6e/v7x
        ),
    )(wb, x2d)

    return y2d.reshape(-1)[:n].reshape(orig_shape)


if __name__ == "__main__":
    key = jax.random.PRNGKey(0)
    kx1, kx2, kx3, kw, kb = jax.random.split(key, 5)

    # nn.Linear(1, 1) parameters: weight [1, 1], bias [1]; PyTorch default
    # init is U(-1, 1) since fan_in = 1.
    weight = jax.random.uniform(kw, (1, 1), jnp.float32, minval=-1.0, maxval=1.0)
    bias = jax.random.uniform(kb, (1,), jnp.float32, minval=-1.0, maxval=1.0)

    # Case 1: tiny batch (the module's natural small shape) -> plain-JAX
    # fast path; kernel dispatch overhead would dwarf 8 FMAs.
    x_small = jax.random.normal(kx1, (8, 1), jnp.float32)
    y_small = jax.block_until_ready(phi_dot_0(x_small, weight, bias))
    ref_small = x_small @ weight.T + bias
    assert y_small.shape == x_small.shape
    assert jnp.allclose(y_small, ref_small, atol=1e-6)

    # Case 2: force the Pallas path on a small, non-tile-multiple batch to
    # exercise the lane-dense pad-and-slice path (single-tile grid).
    x_mid = jax.random.normal(kx2, (2000, 1), jnp.float32)
    y_mid = jax.block_until_ready(
        phi_dot_0(x_mid, weight, bias, min_pallas_elems=1))
    ref_mid = x_mid @ weight.T + bias
    assert y_mid.shape == x_mid.shape
    assert jnp.allclose(y_mid, ref_mid, atol=1e-6)

    # Case 3: force a multi-tile grid (max_tile_rows=8) at a small size to
    # exercise the pipelined 1-D grid + parallel dimension semantics.
    x_multi = jax.random.normal(kx3, (3000, 1), jnp.float32)
    y_multi = jax.block_until_ready(
        phi_dot_0(x_multi, weight, bias, max_tile_rows=8, min_pallas_elems=1))
    ref_multi = x_multi @ weight.T + bias
    assert y_multi.shape == x_multi.shape
    assert jnp.allclose(y_multi, ref_multi, atol=1e-6)

    print("KERNEL_OK")
</pallas_src>

<mosaic_0001>
module attributes {stable_mosaic.version = 11 : i64} {
  func.func @_phi_dot_kernel(%arg0: i32, %arg1: memref<2xf32, #tpu.memory_space<smem>>, %arg2: memref<16x128xf32, #tpu.memory_space<vmem>>, %arg3: memref<16x128xf32, #tpu.memory_space<vmem>>) attributes {dimension_semantics = [#tpu.dimension_semantics<parallel>], iteration_bounds = array<i64: 1>, scalar_prefetch = 1 : i64, scratch_operands = 0 : i64, tpu.core_type = #tpu.core_type<tc>, window_params = [{transform_indices = @transform_0, window_bounds = array<i64: 16, 128>}, {transform_indices = @transform_1, window_bounds = array<i64: 16, 128>}]} {
    %c0 = arith.constant 0 : index
    %0 = memref.load %arg1[%c0] : memref<2xf32, #tpu.memory_space<smem>>
    %c1 = arith.constant 1 : index
    %1 = memref.load %arg1[%c1] : memref<2xf32, #tpu.memory_space<smem>>
    %c0_0 = arith.constant 0 : index
    %c0_1 = arith.constant 0 : index
    %2 = vector.load %arg2[%c0_0, %c0_1] : memref<16x128xf32, #tpu.memory_space<vmem>>, vector<16x128xf32>
    %3 = vector.broadcast %0 : f32 to vector<16x128xf32>
    %4 = arith.mulf %2, %3 : vector<16x128xf32>
    %5 = vector.broadcast %1 : f32 to vector<16x128xf32>
    %6 = arith.addf %4, %5 : vector<16x128xf32>
    %c0_2 = arith.constant 0 : index
    %c0_3 = arith.constant 0 : index
    %7 = vector.load %arg3[%c0_2, %c0_3] : memref<16x128xf32, #tpu.memory_space<vmem>>, vector<16x128xf32>
    tpu.vector_store %arg3[%c0_2, %c0_3], %6 {strides = array<i32>} : memref<16x128xf32, #tpu.memory_space<vmem>>, vector<16x128xf32>,
    return
  }
  func.func @transform_0(%arg0: i32, %arg1: memref<2xf32, #tpu.memory_space<smem>>) -> (i32, i32) {
    %c0_i32 = arith.constant 0 : i32
    %c0_i32_0 = arith.constant 0 : i32
    return %arg0, %c0_i32 : i32, i32
  }
  func.func @transform_1(%arg0: i32, %arg1: memref<2xf32, #tpu.memory_space<smem>>) -> (i32, i32) {
    %c0_i32 = arith.constant 0 : i32
    %c0_i32_0 = arith.constant 0 : i32
    return %arg0, %c0_i32 : i32, i32
  }
}

</mosaic_0001>

<bundles_post_ra>
// kernel: tpu_custom_call.1
= control target key start
LH: loop header
LB: loop body
LE: loop exit
PB: predicated region body
PF: predicated region fallthrough
CT: control target
= control target key end

     0   :  { %s185_s0 = inlined_call_operand.hbm [shape: f32[2], index: 0, kind: input, shape index: {}]   ;;  %s186_s1 = inlined_call_operand.hbm [shape: f32[16,128], index: 1, kind: input, shape index: {}]   ;;  %s187_s2 = inlined_call_operand.hbm [shape: f32[16,128], index: 2, kind: output, shape index: {}]  }
   0x1   :  { %s63_s11 = scalar_lea.hbm %s185_s0, 16 }
   0x2   :  { %p64_p0 = scmp.ne.s32.totalorder %s185_s0, %s63_s11  ;;  %p67_p1 = scmp.lt.u32.totalorder %s63_s11, %s185_s0 }
   0x4   :  { %p69_p2 = pnand %p67_p1, %p64_p0 }
   0x6   :  { %72 = shalt.err (!%p69_p2)  }
   0x7   :  { %s123_s16 = smov [#allocation3]  }
   0x8   :  { %8 = dma.hbm_to_smem %s185_s0, 16, %s123_s16, [#allocation2] }
   0x9   :  { %117 = dma.done.wait [#allocation2], 16 }
   0xa   :  { %118 = vsyncadd [#allocation2], 4294967280 }
   0xb   :  { %10 = sfence }
   0xc   :  { %11 = vsyncpa [#allocation5], 0 }
   0xd   :  { %12 = vsyncpa [#allocation6], 0  ;;  %s124_s19 = smov [#allocation4]   ;;  %s73_s23 = scalar_lea.hbm %s186_s1, 256 }
   0xe   :  { %s18_s20 = sshll.u32 %s124_s19, 4  ;;  %p74_p3 = scmp.ne.s32.totalorder %s186_s1, %s73_s23  ;;  %s19_s20 = int_to_ptr.vmem [resolvable:$true] %s18_s20 }
   0xf   :  { %p77_p4 = scmp.lt.u32.totalorder %s73_s23, %s186_s1 }
  0x11   :  { %p79_p5 = pnand %p77_p4, %p74_p3 }
  0x13   :  { %82 = shalt.err (!%p79_p5)
}
  0x14   :  { %s83_s0 = scalar_lea.vmem %s19_s20, 256  ;;  %p88_p7 = scmp.lt.s32.totalorder %s19_s20, %s19_s20 }
  0x15   :  { %p84_p6 = scmp.ne.s32.totalorder %s19_s20, %s83_s0  ;;  %p89_p8 = scmp.lt.s32.totalorder %s83_s0, %s83_s0 }
  0x17   :  { %p90_p9 = por %p89_p8, %p88_p7 }
  0x19   :  { %p91_p10 = pnand %p90_p9, %p84_p6 }
  0x1b   :  { %94 = shalt.err (!%p91_p10)
}
  0x1c   :  { %s125_s28 = smov 128   ;;  %s126_s29 = smov 8  }
  0x1d   :  { %24 = dma.hbm_to_vmem [thread:$0]  %s186_s1, 256, %s19_s20, [#allocation5], %s125_s28, %s125_s28, %s126_s29  }
  0x1e   :  { %119 = dma.done.wait [#allocation5], 256  }
  0x1f   :  { %120 = vsyncadd [#allocation5], 4294967040  ;;  %s28_s4 = sld [smem:[#allocation3]]  ;;  %s57_s5 = sld [smem:[#allocation3 + $0x1]]  ;;  %v30_v0 = vld [vmem:[#allocation4] sm:$0xff]  ;;  %v31_v3 = vld [vmem:[#allocation4 + $0x8] sm:$0xff] }
  0x20   :  { %s127_s6 = smov [#allocation7]  }
  0x21   :  { %s45_s7 = sshll.u32 %s127_s6, 4  ;;  %s46_s7 = int_to_ptr.vmem [resolvable:$true] %s45_s7 }
  0x22   :  { %s95_s8 = scalar_lea.vmem %s46_s7, 256  ;;  %p100_p12 = scmp.lt.s32.totalorder %s46_s7, %s46_s7 }
  0x23   :  { %p96_p11 = scmp.ne.s32.totalorder %s46_s7, %s95_s8  ;;  %p101_p13 = scmp.lt.s32.totalorder %s95_s8, %s95_s8 }
  0x25   :  { %v32_v1 = vstv %s28_s4  ;;  %v35_v2 = vstv %s57_s5  ;;  %p102_p0 = por %p101_p13, %p100_p12 }
  0x26   :  { %v33_v4 = vmul.f32 %v32_v1, %v30_v0  ;;  %v34_v5 = vmul.f32 %v32_v1, %v31_v3 }
  0x27   :  { %p103_p1 = pnand %p102_p0, %p96_p11 }
  0x28   :  { %v36_v6 = vadd.f32 %v35_v2, %v33_v4  ;;  %v37_v7 = vadd.f32 %v35_v2, %v34_v5 }
  0x2a   :  { %38 = vst [vmem:[#allocation7] sm:$0xff] %v36_v6  ;;  %39 = vst [vmem:[#allocation7 + $0x8] sm:$0xff] %v37_v7 }
  0x2b   :  { %106 = shalt.err (!%p103_p1)
}
  0x2c   :  { %s107_s10 = scalar_lea.hbm %s187_s2, 256 }
  0x2d   :  { %p108_p2 = scmp.ne.s32.totalorder %s187_s2, %s107_s10  ;;  %p111_p3 = scmp.lt.u32.totalorder %s107_s10, %s187_s2 }
  0x2f   :  { %p113_p4 = pnand %p111_p3, %p108_p2 }
  0x31   :  { %116 = shalt.err (!%p113_p4)
}
  0x32   :  { %51 = dma.vmem_to_hbm [thread:$0]  %s46_s7, 256, %s187_s2, [#allocation6], %s125_s28, %s125_s28, %s126_s29  }
  0x33   :  { %121 = dma.done.wait [#allocation6], 256  }
  0x34   :  { %122 = vsyncadd [#allocation6], 4294967040 }
  0x35   :  { %55 = vsyncpa [#allocation5], 1 }
  0x36   :  { %56 = vsyncpa [#allocation6], 1 }

</bundles_post_ra>
